<compile_context>
chip_gen: v7x
topology: tpu7x:2x2x1
jax: 0.10.0
libtpu: 0.0.40
codegen_flags: <defaults>
</compile_context>

<pallas_src>
import math

import jax
import jax.numpy as jnp
import numpy as np
from jax.experimental import pallas as pl
from jax.experimental.pallas import tpu as pltpu
from jax.scipy.special import logsumexp

# ----- Einet configuration (EinetConfig semantics) -----
F_FEAT = 16      # in_features (F)
DEPTH = 2        # tree depth (D)      (kernel is specialised to D == 2)
S_SUM = 4        # sum nodes per layer (S)
I_LEAF = 4       # leaf distributions per scope (I)
R_REP = 2        # repetitions (R)
C_CLS = 3        # classes / root heads (C)

CARD = int(math.ceil(F_FEAT / 2 ** DEPTH))       # leaf cardinality (= 4, pad = 0)
NPROD = 2 ** DEPTH                               # scopes after leaf product layer (= 4)
DH0 = NPROD // 2                                 # scope pairs at layer 0 (= 2)
G0 = 2 * DH0 * R_REP                             # (side, pair, rep) groups at layer 0 (= 8)
G1 = 2 * R_REP                                   # (side, rep) groups at layer 1 (= 4)

LOG_2PI = math.log(2.0 * math.pi)
HIGHEST = jax.lax.Precision.HIGHEST
FAST = jax.lax.Precision.DEFAULT                 # single-pass bf16 on the MXU


# --------------------------------------------------------------------------
# Kernel: full Einet forward for one lane-dense batch block.
# Row layouts (all batch-in-lane):
#   h   (32, bn): row = i*8 + side*4 + (d*2 + r)   (leaf channel i, scope 2d+side, rep r)
#   h1  (16, bn): row = o*4 + (d*2 + r)            (layer-0 out channel o)
#   z   ( 2, bn): row = r
# --------------------------------------------------------------------------
def _einet_kernel(x_ref, wleaf_ref, bias_ref, el0_ref, er0_ref, w0_ref,
                  el1_ref, er1_ref, w1_ref, logw_ref, out_ref):
    x = x_ref[...]                                        # (F, bn)
    xin = jnp.concatenate([x * x, x], axis=0)             # (2F, bn)

    # ---- leaf Normal log-pdf fused with the Product layer, both reps: ONE matmul.
    # HIGHEST: the expanded square (-0.5*isd2*x^2 + mu*isd2*x + c) cancels badly
    # in a single bf16 pass when x ~ mu; this matmul is tiny anyway.
    h = jnp.dot(wleaf_ref[...], xin, preferred_element_type=jnp.float32,
                precision=HIGHEST) + bias_ref[...]        # (32, bn)

    # ---- EinsumLayer 0 (log-einsum-exp), fused over reps and scope pairs ----
    # per-(scope, rep) max over the I leaf channels: channels live in I aligned
    # G0-row slabs, so the segmented max is (I-1) plain VPU maximums.
    bmax = h[0:G0, :]
    for i in range(1, I_LEAF):
        bmax = jnp.maximum(bmax, h[i * G0:(i + 1) * G0, :])            # (8, bn)
    eh = jnp.exp(h - jnp.concatenate([bmax] * I_LEAF, axis=0))         # (32, bn), in (0, 1]

    # kron[(d,r), i, j] = eh[left (d,r,i)] * eh[right (d,r,j)]:
    # two one-hot row-expansion matmuls (MXU gathers) + one VPU multiply.
    k0 = (jnp.dot(el0_ref[...], eh, preferred_element_type=jnp.float32, precision=FAST)
          * jnp.dot(er0_ref[...], eh, preferred_element_type=jnp.float32, precision=FAST))
    p0 = jnp.dot(w0_ref[...], k0, preferred_element_type=jnp.float32,
                 precision=FAST)                                        # (16, bn)
    corr0 = bmax[0:G0 // 2, :] + bmax[G0 // 2:G0, :]                    # (4, bn): lmax+rmax per (d, r)
    h1 = jnp.log(p0) + jnp.concatenate([corr0] * S_SUM, axis=0)        # (16, bn)

    # ---- EinsumLayer 1 (per-rep root scope) ----
    bmax1 = h1[0:G1, :]
    for o in range(1, S_SUM):
        bmax1 = jnp.maximum(bmax1, h1[o * G1:(o + 1) * G1, :])          # (4, bn)
    eh1 = jnp.exp(h1 - jnp.concatenate([bmax1] * S_SUM, axis=0))        # (16, bn)
    k1 = (jnp.dot(el1_ref[...], eh1, preferred_element_type=jnp.float32, precision=FAST)
          * jnp.dot(er1_ref[...], eh1, preferred_element_type=jnp.float32, precision=FAST))
    p1 = jnp.dot(w1_ref[...], k1, preferred_element_type=jnp.float32,
                 precision=FAST)                                        # (R, bn)
    z = jnp.log(p1) + (bmax1[0:R_REP, :] + bmax1[R_REP:2 * R_REP, :])   # (R, bn)

    # ---- root Sum: logsumexp over repetitions (log-softmax weights precomputed) ----
    ys = [z[r:r + 1, :] + logw_ref[r] for r in range(R_REP)]            # (C, bn) each
    m = ys[0]
    for r in range(1, R_REP):
        m = jnp.maximum(m, ys[r])
    s = jnp.exp(ys[0] - m)
    for r in range(1, R_REP):
        s = s + jnp.exp(ys[r] - m)
    out_ref[...] = m + jnp.log(s)                                       # (C, bn)


# --------------------------------------------------------------------------
# Batch-invariant precompute (all hoisted into the wrapper).
# --------------------------------------------------------------------------
def _row_perm_leaf():
    """New leaf row = i*G0 + side*4 + d*2 + r   <-   old flat row (r*P + p)*I + i."""
    perm = np.empty(R_REP * NPROD * I_LEAF, dtype=np.int32)
    for i in range(I_LEAF):
        for side in range(2):
            for d in range(DH0):
                for r in range(R_REP):
                    new = i * G0 + side * (DH0 * R_REP) + d * R_REP + r
                    p = 2 * d + side
                    perm[new] = (r * NPROD + p) * I_LEAF + i
    return perm


def _selection_matrices():
    """One-hot row-expansion matrices that build the kron operands on the MXU."""
    el0 = np.zeros((DH0 * R_REP * I_LEAF * I_LEAF, I_LEAF * G0), np.float32)
    er0 = np.zeros_like(el0)
    for d in range(DH0):
        for r in range(R_REP):
            q = d * R_REP + r
            for i in range(I_LEAF):
                for j in range(I_LEAF):
                    row = q * I_LEAF * I_LEAF + i * I_LEAF + j
                    el0[row, i * G0 + q] = 1.0                       # left  = scope 2d
                    er0[row, j * G0 + DH0 * R_REP + q] = 1.0         # right = scope 2d+1
    el1 = np.zeros((R_REP * S_SUM * S_SUM, S_SUM * G1), np.float32)
    er1 = np.zeros_like(el1)
    for r in range(R_REP):
        for i in range(S_SUM):
            for j in range(S_SUM):
                row = r * S_SUM * S_SUM + i * S_SUM + j
                el1[row, i * G1 + r] = 1.0                           # left  = pair d=0
                er1[row, j * G1 + R_REP + r] = 1.0                   # right = pair d=1
    return el0, er0, el1, er1


def _fused_leaf_weights(rand_indices, means, stds):
    """Normal log-pdf coefficients + scope product + feature permutation, folded
    into a single (32, 2F) weight matrix over the ORIGINAL feature order."""
    isd2 = (1.0 / stds) ** 2                                  # (R, F, I), permuted-pos space
    a = -0.5 * isd2
    b = means * isd2
    c = -0.5 * means * means * isd2 - jnp.log(stds) - 0.5 * LOG_2PI

    inv = jnp.argsort(rand_indices, axis=0)                   # (F, R) inverse permutations
    inv_t = jnp.transpose(inv)                                # (R, F)
    rsel = jnp.arange(R_REP)[:, None]
    a_o = a[rsel, inv_t, :]                                   # (R, F, I) original-feature space
    b_o = b[rsel, inv_t, :]
    scope_g = inv_t // CARD                                   # (R, F) scope of original feature g
    mask = (scope_g[:, :, None] ==
            jnp.arange(NPROD)[None, None, :]).astype(jnp.float32)      # (R, F, P)

    def fold(coef_o):     # (R, F, I) -> (R, P, I, F)
        return (jnp.transpose(coef_o, (0, 2, 1))[:, None, :, :]
                * jnp.transpose(mask, (0, 2, 1))[:, :, None, :])

    w_x2 = fold(a_o).reshape(R_REP * NPROD * I_LEAF, F_FEAT)
    w_x1 = fold(b_o).reshape(R_REP * NPROD * I_LEAF, F_FEAT)
    bias = c.reshape(R_REP, NPROD, CARD, I_LEAF).sum(axis=2).reshape(-1)

    rp = _row_perm_leaf()
    wleaf = jnp.concatenate([w_x2, w_x1], axis=1)[rp]         # (32, 2F)
    bias = bias[rp][:, None]                                  # (32, 1)
    return wleaf, bias


def _fused_layer_weights(layer_ws):
    """Pre-softmaxed EinsumLayer weights assembled into block-permuted matrices."""
    wsm0 = jax.nn.softmax(layer_ws[0], axis=2)                # (R, DH0, I*I, S)
    rows, cols, ri, di, ij, oi = [], [], [], [], [], []
    for d in range(DH0):
        for r in range(R_REP):
            q = d * R_REP + r
            for o in range(S_SUM):
                for i in range(I_LEAF):
                    for j in range(I_LEAF):
                        rows.append(o * (DH0 * R_REP) + q)
                        cols.append(q * I_LEAF * I_LEAF + i * I_LEAF + j)
                        ri.append(r); di.append(d); ij.append(i * I_LEAF + j); oi.append(o)
    w0 = jnp.zeros((S_SUM * DH0 * R_REP, DH0 * R_REP * I_LEAF * I_LEAF), jnp.float32)
    w0 = w0.at[np.array(rows), np.array(cols)].set(
        wsm0[np.array(ri), np.array(di), np.array(ij), np.array(oi)])

    wsm1 = jax.nn.softmax(layer_ws[1], axis=2)                # (R, 1, S*S, 1)
    rows, cols, ri, ij = [], [], [], []
    for r in range(R_REP):
        for i in range(S_SUM):
            for j in range(S_SUM):
                rows.append(r)
                cols.append(r * S_SUM * S_SUM + i * S_SUM + j)
                ri.append(r); ij.append(i * S_SUM + j)
    w1 = jnp.zeros((R_REP, R_REP * S_SUM * S_SUM), jnp.float32)
    w1 = w1.at[np.array(rows), np.array(cols)].set(
        wsm1[np.array(ri), 0, np.array(ij), 0])
    return w0, w1


def einet_forward_pallas(x, rand_indices, means, stds, layer_ws, root_w, *, block_n=1024):
    n = x.shape[0]

    def rup(v, m):
        return ((v + m - 1) // m) * m

    # lane-dense blocks (multiple of 128); cap padding for small N and keep the
    # grid at >= 2 steps when possible so v7x can shard blocks across both TCs.
    bn = int(min(block_n, max(128, rup(-(-n // 2), 128))))
    n_pad = rup(n, bn)

    xt = jnp.transpose(x).astype(jnp.float32)                 # (F, N), batch in lanes
    if n_pad != n:
        xt = jnp.pad(xt, ((0, 0), (0, n_pad - n)))

    # ---- batch-invariant precompute ----
    wleaf, bias = _fused_leaf_weights(rand_indices, means, stds)
    w0, w1 = _fused_layer_weights(layer_ws)
    el0, er0, el1, er1 = (jnp.asarray(m) for m in _selection_matrices())
    logw = jax.nn.log_softmax(root_w, axis=0)[:, :, None]     # (R, C, 1)

    def const2(shape):
        return pl.BlockSpec(shape, lambda i: (0, 0))

    in_specs = [
        pl.BlockSpec((F_FEAT, bn), lambda i: (0, i)),         # lane-dense x^T block
        const2(wleaf.shape), const2(bias.shape),
        const2(el0.shape), const2(er0.shape), const2(w0.shape),
        const2(el1.shape), const2(er1.shape), const2(w1.shape),
        pl.BlockSpec(logw.shape, lambda i: (0, 0, 0)),
    ]

    out = pl.pallas_call(
        _einet_kernel,
        out_shape=jax.ShapeDtypeStruct((C_CLS, n_pad), jnp.float32),
        grid=(n_pad // bn,),
        in_specs=in_specs,
        out_specs=pl.BlockSpec((C_CLS, bn), lambda i: (0, i)),
        compiler_params=pltpu.CompilerParams(dimension_semantics=("parallel",)),
    )(xt, wleaf, bias, el0, er0, w0, el1, er1, w1, logw)

    return jnp.transpose(out, (1, 0))[:n]                     # (N, C)


# --------------------------------------------------------------------------
# Pure-JAX reference mirroring the PyTorch forward (NFCR convention).
# --------------------------------------------------------------------------
def einet_forward_ref(x, rand_indices, means, stds, layer_ws, root_w):
    n = x.shape[0]
    pad = int(2 ** DEPTH - F_FEAT / CARD)
    xp = jnp.take(x, rand_indices, axis=1)                 # (N, F, R)
    mu = jnp.transpose(means, (1, 2, 0))[None]             # (1, F, I, R)
    sd = jnp.transpose(stds, (1, 2, 0))[None]
    xe = xp[:, :, None, :]                                 # (N, F, 1, R)
    ll = -0.5 * ((xe - mu) / sd) ** 2 - jnp.log(sd) - 0.5 * LOG_2PI
    if pad:
        ll = jnp.pad(ll, ((0, 0), (0, pad), (0, 0), (0, 0)))
    h = ll.reshape(n, NPROD, CARD, I_LEAF, R_REP).sum(axis=2)   # (N, 2^D, I, R)
    for layer in range(DEPTH):
        w = layer_ws[layer]
        c_in = h.shape[2]
        left, right = h[:, 0::2], h[:, 1::2]
        lmax = left.max(axis=2, keepdims=True)
        rmax = right.max(axis=2, keepdims=True)
        lp = jnp.exp(left - lmax)
        rp = jnp.exp(right - rmax)
        wsm = jax.nn.softmax(w, axis=2).reshape(R_REP, w.shape[1], c_in, c_in, w.shape[3])
        prob = jnp.einsum("ndir,ndjr,rdijo->ndor", lp, rp, wsm, precision="highest")
        h = jnp.log(prob) + lmax + rmax
    z = h[:, 0, 0, :]                                      # (N, R)
    logw = jax.nn.log_softmax(root_w, axis=0)              # (R, C)
    return logsumexp(z[:, :, None] + logw[None], axis=1)   # (N, C)


if __name__ == "__main__":
    key = jax.random.PRNGKey(0)
    k_x, k_perm, k_mu, k_sd, k_w, k_root = jax.random.split(key, 6)

    N_BATCH = 512   # -> 2 lane-dense batch blocks of 256: both TCs busy on v7x
    x = jax.random.normal(k_x, (N_BATCH, F_FEAT), dtype=jnp.float32)

    # random (but deterministic) per-repetition permutation indices, shape (F, R)
    rand_indices = jnp.stack(
        [jax.random.permutation(jax.random.fold_in(k_perm, r), F_FEAT) for r in range(R_REP)],
        axis=1,
    )

    # leaf Normal parameters (PyTorch shape (1, F, I, R) -> stored as (R, F, I))
    means = jax.random.normal(k_mu, (R_REP, F_FEAT, I_LEAF), dtype=jnp.float32)
    stds = jax.random.uniform(k_sd, (R_REP, F_FEAT, I_LEAF),
                              minval=0.5, maxval=1.5, dtype=jnp.float32)

    # EinsumLayer weights: PyTorch (Dh, R, S, S, O) -> stored as (R, Dh, S*S, O)
    layer_ws = []
    for layer in range(DEPTH):
        dh = 2 ** (DEPTH - 1 - layer)
        o_ch = S_SUM if layer < DEPTH - 1 else 1
        layer_ws.append(
            0.5 * jax.random.normal(jax.random.fold_in(k_w, layer),
                                    (R_REP, dh, S_SUM * S_SUM, o_ch), dtype=jnp.float32))

    # root Sum weights: PyTorch (1, R, C, 1) -> stored as (R, C), ~truncated_normal(std=0.5)
    root_w = 0.5 * jax.random.normal(k_root, (R_REP, C_CLS), dtype=jnp.float32)

    out = einet_forward_pallas(x, rand_indices, means, stds, layer_ws, root_w)
    out = jax.block_until_ready(out)

    ref = jax.block_until_ready(
        einet_forward_ref(x, rand_indices, means, stds, layer_ws, root_w))

    assert out.shape == (N_BATCH, C_CLS)
    np.testing.assert_allclose(np.asarray(out), np.asarray(ref), rtol=2e-3, atol=2e-3)
    print("KERNEL_OK")
</pallas_src>

<mosaic_0001>
module attributes {stable_mosaic.version = 11 : i64} {
  func.func @_einet_kernel(%arg0: i32, %arg1: memref<16x256xf32, #tpu.memory_space<vmem>>, %arg2: memref<32x32xf32, #tpu.memory_space<vmem>>, %arg3: memref<32x1xf32, #tpu.memory_space<vmem>>, %arg4: memref<64x32xf32, #tpu.memory_space<vmem>>, %arg5: memref<64x32xf32, #tpu.memory_space<vmem>>, %arg6: memref<16x64xf32, #tpu.memory_space<vmem>>, %arg7: memref<32x16xf32, #tpu.memory_space<vmem>>, %arg8: memref<32x16xf32, #tpu.memory_space<vmem>>, %arg9: memref<2x32xf32, #tpu.memory_space<vmem>>, %arg10: memref<2x3x1xf32, #tpu.memory_space<vmem>>, %arg11: memref<3x256xf32, #tpu.memory_space<vmem>>) attributes {dimension_semantics = [#tpu.dimension_semantics<parallel>], iteration_bounds = array<i64: 2>, scalar_prefetch = 0 : i64, scratch_operands = 0 : i64, tpu.core_type = #tpu.core_type<tc>, window_params = [{transform_indices = @transform_0, window_bounds = array<i64: 16, 256>}, {pipeline_mode = #tpu.pipeline_mode<synchronous>, transform_indices = @transform_1, window_bounds = array<i64: 32, 32>}, {pipeline_mode = #tpu.pipeline_mode<synchronous>, transform_indices = @transform_2, window_bounds = array<i64: 32, 1>}, {pipeline_mode = #tpu.pipeline_mode<synchronous>, transform_indices = @transform_3, window_bounds = array<i64: 64, 32>}, {pipeline_mode = #tpu.pipeline_mode<synchronous>, transform_indices = @transform_4, window_bounds = array<i64: 64, 32>}, {pipeline_mode = #tpu.pipeline_mode<synchronous>, transform_indices = @transform_5, window_bounds = array<i64: 16, 64>}, {pipeline_mode = #tpu.pipeline_mode<synchronous>, transform_indices = @transform_6, window_bounds = array<i64: 32, 16>}, {pipeline_mode = #tpu.pipeline_mode<synchronous>, transform_indices = @transform_7, window_bounds = array<i64: 32, 16>}, {pipeline_mode = #tpu.pipeline_mode<synchronous>, transform_indices = @transform_8, window_bounds = array<i64: 2, 32>}, {pipeline_mode = #tpu.pipeline_mode<synchronous>, transform_indices = @transform_9, window_bounds = array<i64: 2, 3, 1>}, {transform_indices = @transform_10, window_bounds = array<i64: 3, 256>}]} {
    %c0 = arith.constant 0 : index
    %c0_0 = arith.constant 0 : index
    %0 = vector.load %arg1[%c0, %c0_0] : memref<16x256xf32, #tpu.memory_space<vmem>>, vector<16x256xf32>
    %1 = arith.mulf %0, %0 : vector<16x256xf32>
    %2 = tpu.concatenate %1, %0 in 0 : vector<16x256xf32>, vector<16x256xf32> -> vector<32x256xf32>
    %c0_1 = arith.constant 0 : index
    %c0_2 = arith.constant 0 : index
    %3 = vector.load %arg2[%c0_1, %c0_2] : memref<32x32xf32, #tpu.memory_space<vmem>>, vector<32x32xf32>
    %cst = arith.constant dense<0.000000e+00> : vector<32x256xf32>
    %4 = tpu.matmul %3, %2, %cst {dimension_numbers = #tpu.dot_dimension_numbers<[1], [0], [0], [1], [0, 0, 1, 1], [], []>, precision = #tpu.contract_precision<fp32>} : vector<32x32xf32>, vector<32x256xf32>, vector<32x256xf32> -> vector<32x256xf32>
    %c0_3 = arith.constant 0 : index
    %c0_4 = arith.constant 0 : index
    %5 = vector.load %arg3[%c0_3, %c0_4] : memref<32x1xf32, #tpu.memory_space<vmem>>, vector<32x1xf32>
    %6 = vector.broadcast %5 : vector<32x1xf32> to vector<32x256xf32>
    %7 = arith.addf %4, %6 : vector<32x256xf32>
    %8 = vector.extract_strided_slice %7 {offsets = [0, 0], sizes = [8, 256], strides = [1, 1]} : vector<32x256xf32> to vector<8x256xf32>
    %9 = vector.extract_strided_slice %7 {offsets = [8, 0], sizes = [8, 256], strides = [1, 1]} : vector<32x256xf32> to vector<8x256xf32>
    %10 = arith.maximumf %8, %9 : vector<8x256xf32>
    %11 = vector.extract_strided_slice %7 {offsets = [16, 0], sizes = [8, 256], strides = [1, 1]} : vector<32x256xf32> to vector<8x256xf32>
    %12 = arith.maximumf %10, %11 : vector<8x256xf32>
    %13 = vector.extract_strided_slice %7 {offsets = [24, 0], sizes = [8, 256], strides = [1, 1]} : vector<32x256xf32> to vector<8x256xf32>
    %14 = arith.maximumf %12, %13 : vector<8x256xf32>
    %15 = tpu.concatenate %14, %14, %14, %14 in 0 : vector<8x256xf32>, vector<8x256xf32>, vector<8x256xf32>, vector<8x256xf32> -> vector<32x256xf32>
    %16 = arith.subf %7, %15 : vector<32x256xf32>
    %17 = math.exp %16 : vector<32x256xf32>
    %c0_5 = arith.constant 0 : index
    %c0_6 = arith.constant 0 : index
    %18 = vector.load %arg4[%c0_5, %c0_6] : memref<64x32xf32, #tpu.memory_space<vmem>>, vector<64x32xf32>
    %cst_7 = arith.constant dense<0.000000e+00> : vector<64x256xf32>
    %19 = tpu.matmul %18, %17, %cst_7 {dimension_numbers = #tpu.dot_dimension_numbers<[1], [0], [0], [1], [0, 0, 1, 1], [], []>} : vector<64x32xf32>, vector<32x256xf32>, vector<64x256xf32> -> vector<64x256xf32>
    %c0_8 = arith.constant 0 : index
    %c0_9 = arith.constant 0 : index
    %20 = vector.load %arg5[%c0_8, %c0_9] : memref<64x32xf32, #tpu.memory_space<vmem>>, vector<64x32xf32>
    %cst_10 = arith.constant dense<0.000000e+00> : vector<64x256xf32>
    %21 = tpu.matmul %20, %17, %cst_10 {dimension_numbers = #tpu.dot_dimension_numbers<[1], [0], [0], [1], [0, 0, 1, 1], [], []>} : vector<64x32xf32>, vector<32x256xf32>, vector<64x256xf32> -> vector<64x256xf32>
    %22 = arith.mulf %19, %21 : vector<64x256xf32>
    %c0_11 = arith.constant 0 : index
    %c0_12 = arith.constant 0 : index
    %23 = vector.load %arg6[%c0_11, %c0_12] : memref<16x64xf32, #tpu.memory_space<vmem>>, vector<16x64xf32>
    %cst_13 = arith.constant dense<0.000000e+00> : vector<16x256xf32>
    %24 = tpu.matmul %23, %22, %cst_13 {dimension_numbers = #tpu.dot_dimension_numbers<[1], [0], [0], [1], [0, 0, 1, 1], [], []>} : vector<16x64xf32>, vector<64x256xf32>, vector<16x256xf32> -> vector<16x256xf32>
    %25 = vector.extract_strided_slice %14 {offsets = [0, 0], sizes = [4, 256], strides = [1, 1]} : vector<8x256xf32> to vector<4x256xf32>
    %26 = vector.extract_strided_slice %14 {offsets = [4, 0], sizes = [4, 256], strides = [1, 1]} : vector<8x256xf32> to vector<4x256xf32>
    %27 = arith.addf %25, %26 : vector<4x256xf32>
    %28 = math.log %24 : vector<16x256xf32>
    %29 = tpu.concatenate %27, %27, %27, %27 in 0 : vector<4x256xf32>, vector<4x256xf32>, vector<4x256xf32>, vector<4x256xf32> -> vector<16x256xf32>
    %30 = arith.addf %28, %29 : vector<16x256xf32>
    %31 = vector.extract_strided_slice %30 {offsets = [0, 0], sizes = [4, 256], strides = [1, 1]} : vector<16x256xf32> to vector<4x256xf32>
    %32 = vector.extract_strided_slice %30 {offsets = [4, 0], sizes = [4, 256], strides = [1, 1]} : vector<16x256xf32> to vector<4x256xf32>
    %33 = arith.maximumf %31, %32 : vector<4x256xf32>
    %34 = vector.extract_strided_slice %30 {offsets = [8, 0], sizes = [4, 256], strides = [1, 1]} : vector<16x256xf32> to vector<4x256xf32>
    %35 = arith.maximumf %33, %34 : vector<4x256xf32>
    %36 = vector.extract_strided_slice %30 {offsets = [12, 0], sizes = [4, 256], strides = [1, 1]} : vector<16x256xf32> to vector<4x256xf32>
    %37 = arith.maximumf %35, %36 : vector<4x256xf32>
    %38 = tpu.concatenate %37, %37, %37, %37 in 0 : vector<4x256xf32>, vector<4x256xf32>, vector<4x256xf32>, vector<4x256xf32> -> vector<16x256xf32>
    %39 = arith.subf %30, %38 : vector<16x256xf32>
    %40 = math.exp %39 : vector<16x256xf32>
    %c0_14 = arith.constant 0 : index
    %c0_15 = arith.constant 0 : index
    %41 = vector.load %arg7[%c0_14, %c0_15] : memref<32x16xf32, #tpu.memory_space<vmem>>, vector<32x16xf32>
    %cst_16 = arith.constant dense<0.000000e+00> : vector<32x256xf32>
    %42 = tpu.matmul %41, %40, %cst_16 {dimension_numbers = #tpu.dot_dimension_numbers<[1], [0], [0], [1], [0, 0, 1, 1], [], []>} : vector<32x16xf32>, vector<16x256xf32>, vector<32x256xf32> -> vector<32x256xf32>
    %c0_17 = arith.constant 0 : index
    %c0_18 = arith.constant 0 : index
    %43 = vector.load %arg8[%c0_17, %c0_18] : memref<32x16xf32, #tpu.memory_space<vmem>>, vector<32x16xf32>
    %cst_19 = arith.constant dense<0.000000e+00> : vector<32x256xf32>
    %44 = tpu.matmul %43, %40, %cst_19 {dimension_numbers = #tpu.dot_dimension_numbers<[1], [0], [0], [1], [0, 0, 1, 1], [], []>} : vector<32x16xf32>, vector<16x256xf32>, vector<32x256xf32> -> vector<32x256xf32>
    %45 = arith.mulf %42, %44 : vector<32x256xf32>
    %c0_20 = arith.constant 0 : index
    %c0_21 = arith.constant 0 : index
    %46 = vector.load %arg9[%c0_20, %c0_21] : memref<2x32xf32, #tpu.memory_space<vmem>>, vector<2x32xf32>
    %cst_22 = arith.constant dense<0.000000e+00> : vector<2x256xf32>
    %47 = tpu.matmul %46, %45, %cst_22 {dimension_numbers = #tpu.dot_dimension_numbers<[1], [0], [0], [1], [0, 0, 1, 1], [], []>} : vector<2x32xf32>, vector<32x256xf32>, vector<2x256xf32> -> vector<2x256xf32>
    %48 = math.log %47 : vector<2x256xf32>
    %49 = vector.extract_strided_slice %37 {offsets = [0, 0], sizes = [2, 256], strides = [1, 1]} : vector<4x256xf32> to vector<2x256xf32>
    %50 = vector.extract_strided_slice %37 {offsets = [2, 0], sizes = [2, 256], strides = [1, 1]} : vector<4x256xf32> to vector<2x256xf32>
    %51 = arith.addf %49, %50 : vector<2x256xf32>
    %52 = arith.addf %48, %51 : vector<2x256xf32>
    %53 = vector.extract_strided_slice %52 {offsets = [0, 0], sizes = [1, 256], strides = [1, 1]} : vector<2x256xf32> to vector<1x256xf32>
    %c0_23 = arith.constant 0 : index
    %c0_24 = arith.constant 0 : index
    %c0_25 = arith.constant 0 : index
    %54 = vector.load %arg10[%c0_23, %c0_24, %c0_25] : memref<2x3x1xf32, #tpu.memory_space<vmem>>, vector<1x3x1xf32>
    %55 = vector.shape_cast %54 : vector<1x3x1xf32> to vector<3x1xf32>
    %56 = vector.broadcast %53 : vector<1x256xf32> to vector<3x256xf32>
    %57 = vector.broadcast %55 : vector<3x1xf32> to vector<3x256xf32>
    %58 = arith.addf %56, %57 : vector<3x256xf32>
    %59 = vector.extract_strided_slice %52 {offsets = [1, 0], sizes = [1, 256], strides = [1, 1]} : vector<2x256xf32> to vector<1x256xf32>
    %c1 = arith.constant 1 : index
    %c0_26 = arith.constant 0 : index
    %c0_27 = arith.constant 0 : index
    %60 = vector.load %arg10[%c1, %c0_26, %c0_27] : memref<2x3x1xf32, #tpu.memory_space<vmem>>, vector<1x3x1xf32>
    %61 = vector.shape_cast %60 : vector<1x3x1xf32> to vector<3x1xf32>
    %62 = vector.broadcast %59 : vector<1x256xf32> to vector<3x256xf32>
    %63 = vector.broadcast %61 : vector<3x1xf32> to vector<3x256xf32>
    %64 = arith.addf %62, %63 : vector<3x256xf32>
    %65 = arith.maximumf %58, %64 : vector<3x256xf32>
    %66 = arith.subf %58, %65 : vector<3x256xf32>
    %67 = math.exp %66 : vector<3x256xf32>
    %68 = arith.subf %64, %65 : vector<3x256xf32>
    %69 = math.exp %68 : vector<3x256xf32>
    %70 = arith.addf %67, %69 : vector<3x256xf32>
    %71 = math.log %70 : vector<3x256xf32>
    %72 = arith.addf %65, %71 : vector<3x256xf32>
    %c0_28 = arith.constant 0 : index
    %c0_29 = arith.constant 0 : index
    %73 = vector.load %arg11[%c0_28, %c0_29] : memref<3x256xf32, #tpu.memory_space<vmem>>, vector<3x256xf32>
    tpu.vector_store %arg11[%c0_28, %c0_29], %72 {strides = array<i32>} : memref<3x256xf32, #tpu.memory_space<vmem>>, vector<3x256xf32>,
    return
  }
  func.func @transform_0(%arg0: i32) -> (i32, i32) {
    %c0_i32 = arith.constant 0 : i32
    %c0_i32_0 = arith.constant 0 : i32
    return %c0_i32, %arg0 : i32, i32
  }
  func.func @transform_1(%arg0: i32) -> (i32, i32) {
    %c0_i32 = arith.constant 0 : i32
    %c0_i32_0 = arith.constant 0 : i32
    %c0_i32_1 = arith.constant 0 : i32
    return %c0_i32, %c0_i32_0 : i32, i32
  }
  func.func @transform_2(%arg0: i32) -> (i32, i32) {
    %c0_i32 = arith.constant 0 : i32
    %c0_i32_0 = arith.constant 0 : i32
    %c0_i32_1 = arith.constant 0 : i32
    return %c0_i32, %c0_i32_0 : i32, i32
  }
  func.func @transform_3(%arg0: i32) -> (i32, i32) {
    %c0_i32 = arith.constant 0 : i32
    %c0_i32_0 = arith.constant 0 : i32
    %c0_i32_1 = arith.constant 0 : i32
    return %c0_i32, %c0_i32_0 : i32, i32
  }
  func.func @transform_4(%arg0: i32) -> (i32, i32) {
    %c0_i32 = arith.constant 0 : i32
    %c0_i32_0 = arith.constant 0 : i32
    %c0_i32_1 = arith.constant 0 : i32
    return %c0_i32, %c0_i32_0 : i32, i32
  }
  func.func @transform_5(%arg0: i32) -> (i32, i32) {
    %c0_i32 = arith.constant 0 : i32
    %c0_i32_0 = arith.constant 0 : i32
    %c0_i32_1 = arith.constant 0 : i32
    return %c0_i32, %c0_i32_0 : i32, i32
  }
  func.func @transform_6(%arg0: i32) -> (i32, i32) {
    %c0_i32 = arith.constant 0 : i32
    %c0_i32_0 = arith.constant 0 : i32
    %c0_i32_1 = arith.constant 0 : i32
    return %c0_i32, %c0_i32_0 : i32, i32
  }
  func.func @transform_7(%arg0: i32) -> (i32, i32) {
    %c0_i32 = arith.constant 0 : i32
    %c0_i32_0 = arith.constant 0 : i32
    %c0_i32_1 = arith.constant 0 : i32
    return %c0_i32, %c0_i32_0 : i32, i32
  }
  func.func @transform_8(%arg0: i32) -> (i32, i32) {
    %c0_i32 = arith.constant 0 : i32
    %c0_i32_0 = arith.constant 0 : i32
    %c0_i32_1 = arith.constant 0 : i32
    return %c0_i32, %c0_i32_0 : i32, i32
  }
  func.func @transform_9(%arg0: i32) -> (i32, i32, i32) {
    %c0_i32 = arith.constant 0 : i32
    %c0_i32_0 = arith.constant 0 : i32
    %c0_i32_1 = arith.constant 0 : i32
    %c0_i32_2 = arith.constant 0 : i32
    return %c0_i32, %c0_i32_0, %c0_i32_1 : i32, i32, i32
  }
  func.func @transform_10(%arg0: i32) -> (i32, i32) {
    %c0_i32 = arith.constant 0 : i32
    %c0_i32_0 = arith.constant 0 : i32
    return %c0_i32, %arg0 : i32, i32
  }
}

</mosaic_0001>

<bundles_post_ra>
// kernel: tpu_custom_call.1
= control target key start
LH: loop header
LB: loop body
LE: loop exit
PB: predicated region body
PF: predicated region fallthrough
CT: control target
= control target key end

     0   :  { %15 = vsyncpa [#allocation4], 0  ;;  %s2934_s0 = inlined_call_operand.vmem [shape: f32[16,512], index: 0, kind: input, shape index: {}]   ;;  %s2935_s1 = inlined_call_operand.vmem [shape: f32[32,32], index: 1, kind: input, shape index: {}]   ;;  %s2936_s2 = inlined_call_operand.vmem [shape: f32[32,1], index: 2, kind: input, shape index: {}]   ;;  %s2937_s3 = inlined_call_operand.vmem [shape: f32[64,32], index: 3, kind: input, shape index: {}]   ;;  %s2938_s4 = inlined_call_operand.vmem [shape: f32[64,32], index: 4, kind: input, shape index: {}]   ;;  %s2939_s5 = inlined_call_operand.vmem [shape: f32[16,64], index: 5, kind: input, shape index: {}]   ;;  %s2940_s6 = inlined_call_operand.vmem [shape: f32[32,16], index: 6, kind: input, shape index: {}]   ;;  %s2941_s7 = inlined_call_operand.vmem [shape: f32[32,16], index: 7, kind: input, shape index: {}]   ;;  %s2942_s8 = inlined_call_operand.vmem [shape: f32[2,32], index: 8, kind: input, shape index: {}]   ;;  %s2943_s9 = inlined_call_operand.vmem [shape: f32[2,3,1], index: 9, kind: input, shape index: {}]   ;;  %s2944_s10 = inlined_call_operand.hbm [shape: f32[3,512], index: 10, kind: output, shape index: {}]  }
   0x1   :  { %17 = vsyncpa [#allocation4 + $0x1], 0  ;;  %s2461_s13 = smov 0   ;;  %s2463_s14 = smov 0  }
   0x2   :  { %s2465_s15 = smov 0   ;;  %s2467_s16 = smov 0  }
   0x3 LB: > { %s2059_s17 = sadd.s32 4294967295, %s2401_s16   ;;  %s2060_s18 = sadd.s32 4294967294, %s2401_s16   ;;  %s2401_s16 = sphi %s2467_s16, %s2950_s16   ;;  %s2397_s15 = sphi %s2465_s15, %s2949_s15   ;;  %s2393_s14 = sphi %s2463_s14, %s2948_s14   ;;  %s2389_s13 = sphi %s2461_s13, %s2947_s13  }
   0x4   : > { %s2484_s19 = sadd.s32 1, %s2401_s16   ;;  %s30_s20 = sadd.s32 1, %s2397_s15 }
   0x5   : > { %s27_s21 = ssub.s32 %s2401_s16, %s2484_s19  ;;  %p37_p0 = scmp.ne.s32.totalorder %s2397_s15, %s2393_s14 }
   0x6   : > { %p28_p1 = scmp.eq.s32.totalorder %s27_s21, 0  ;;  %p38_p2 = scmp.eq.s32.totalorder %s2401_s16, 0 }
   0x7   : > { %p256_p3 = scmp.eq.s32.totalorder %s2059_s17, 1  ;;  %p261_p4 = scmp.ne.s32.totalorder %s2393_s14, %s2389_s13 }
   0x8   : > { %s2497_s22 = scalar_select %p28_p1, %s2397_s15, %s30_s20  }
   0x9   : > { %p39_p5 = por %p38_p2, %p37_p0  ;;  %p2499_p6 = por %p256_p3, %p37_p0 }
   0xa   : > { %p262_p7 = scmp.eq.s32.totalorder %s2060_s18, 1  ;;  %p2062_p9 = scmp.ge.s32.totalorder %s2401_s16, 2 }
   0xc   : > { %p2503_p8 = por %p262_p7, %p261_p4  ;;  %305 = sbr.rel (%p2062_p9) target bundleno = 26 (0x1a), region = 52 }
  0x13   : > { %308 = sbr.rel (!%p39_p5) target bundleno = 26 (0x1a), region = 56  ;;  %s310_s25 = sand.u32 (%p39_p5), 1, %s2397_s15  }
  0x14   : > { %s2102_s26 = sshll.u32 (%p39_p5), %s2401_s16, 4  ;;  %s2063_s27 = sshll.u32 (%p39_p5), %s310_s25, 5 }
  0x15   : > { %s315_s30 = scalar_lea.vmem (%p39_p5), %s2934_s0, %s2102_s26  ;;  %s312_s11 = scalar_lea.vmem (%p39_p5), [#allocation2], %s2063_s27 }
  0x16   : > { %v328_v0 = vld [vmem:[%s315_s30] sm:$0xff] (%p39_p5)  ;;  %v330_v1 = vld [vmem:[%s315_s30 + $0x8] sm:$0xff] (%p39_p5) }
  0x17   : > { %v332_v2 = vld [vmem:[%s315_s30 + $0x20] sm:$0xff] (%p39_p5)  ;;  %329 = vst [vmem:[%s312_s11] sm:$0xff] (%p39_p5), %v328_v0  ;;  %331 = vst [vmem:[%s312_s11 + $0x8] sm:$0xff] (%p39_p5), %v330_v1  ;;  %v334_v3 = vld [vmem:[%s315_s30 + $0x28] sm:$0xff] (%p39_p5) }
  0x18   : > { %333 = vst [vmem:[%s312_s11 + $0x10] sm:$0xff] (%p39_p5), %v332_v2  ;;  %335 = vst [vmem:[%s312_s11 + $0x18] sm:$0xff] (%p39_p5), %v334_v3 }
  0x1a PF: > { %p2066_p10 = scmp.ge.s32.totalorder %s2401_s16, 1  ;;  %p340_p11 = scmp.lt.s32.totalorder %s2401_s16, 3 }
  0x1c   : > { %p341_p12 = pnand %p2066_p10, %p340_p11 }
  0x1d   : > { %s2518_s12 = sand.u32 (!%p341_p12), 1, %s2393_s14   ;;  %v394_v4 = vld [vmem:[%s2935_s1] sm:$0xff] (!%p341_p12)  ;;  %vm422_vm0 = vcmask (!%p341_p12), 261120   ;;  %v395_v5 = vld [vmem:[%s2935_s1 + $0x8] sm:$0xff] (!%p341_p12)  ;;  %v396_v6 = vld [vmem:[%s2935_s1 + $0x10] sm:$0xff] (!%p341_p12)  ;;  %v2403_v7 = vmov (!%p341_p12), 0.0  }
  0x1e   : > { %344 = sbr.rel (%p341_p12) target bundleno = 1460 (0x5b4), region = 79  ;;  %s2067_s28 = sshll.u32 (!%p341_p12), %s2518_s12, 5  ;;  %507 = vmatprep.mubr.f32.mxu0 (!%p341_p12), %v2403_v7  ;;  %v424_v8 = vsel (!%p341_p12), %vm422_vm0, %v394_v4, 0  ;;  %v427_v9 = vsel (!%p341_p12), %vm422_vm0, %v395_v5, 0  ;;  %v430_v10 = vsel (!%p341_p12), %vm422_vm0, %v396_v6, 0  ;;  %v397_v11 = vld [vmem:[%s2935_s1 + $0x18] sm:$0xff] (!%p341_p12)  ;;  %1251 = vmatprep.mubr.f32.mxu1 (!%p341_p12), %v2403_v7 }
  0x1f   : > { %v2538_v12 = vand.u32 (!%p341_p12), 4294901760, %v424_v8  ;;  %v2404_v13 = vmov (!%p341_p12), 0   ;;  %v398_v14 = vld [vmem:[%s2936_s2] sm:$0xff] (!%p341_p12)  ;;  %s349_s20 = scalar_lea.vmem (!%p341_p12), [#allocation2], %s2067_s28  ;;  %v2543_v18 = vand.u32 (!%p341_p12), 4294901760, %v427_v9  ;;  %v2545_v19 = vand.u32 (!%p341_p12), 4294901760, %v430_v10 }
  0x20   : > { %2289 = vset.pattern.permute.xlu0 (!%p341_p12), %v2404_v13  ;;  %2290 = vset.pattern.permute.xlu1 (!%p341_p12), %v2404_v13  ;;  %v387_v15 = vld [vmem:[%s349_s20 + $0x8] sm:$0xff] (!%p341_p12)  ;;  %v389_v16 = vld [vmem:[%s349_s20 + $0x18] sm:$0xff] (!%p341_p12)  ;;  %v386_v17 = vld [vmem:[%s349_s20] sm:$0xff] (!%p341_p12)  ;;  %v433_v20 = vsel (!%p341_p12), %vm422_vm0, %v397_v11, 0  ;;  %vm1463_vm1 = vcmask (!%p341_p12), 523264   ;;  %vm1569_vm2 = vcmask (!%p341_p12), 1043456  }
  0x21   : > { %404 = vperm.xlu0 (!%p341_p12), %2289, %v398_v14   ;;  %v391_v21 = vmul.f32 (!%p341_p12), %v387_v15, %v387_v15  ;;  %v393_v22 = vmul.f32 (!%p341_p12), %v389_v16, %v389_v16  ;;  %v388_v23 = vld [vmem:[%s349_s20 + $0x10] sm:$0xff] (!%p341_p12)  ;;  %v390_v24 = vmul.f32 (!%p341_p12), %v386_v17, %v386_v17  ;;  %v443_v25 = vand.u32 (!%p341_p12), 4294901760, %v387_v15  ;;  %v399_v27 = vld [vmem:[%s2936_s2 + $0x8] sm:$0xff] (!%p341_p12)  ;;  %v401_v36 = vld [vmem:[%s2936_s2 + $0x18] sm:$0xff] (!%p341_p12)  ;;  %s2068_s28 = sshll.u32 (!%p341_p12), %s2518_s12, 3  ;;  %s2103_s29 = sshll.u32 (!%p341_p12), %s2059_s17, 7 }
  0x22   : > { %v400_v26 = vld [vmem:[%s2936_s2 + $0x10] sm:$0xff] (!%p341_p12)  ;;  %v392_v28 = vmul.f32 (!%p341_p12), %v388_v23, %v388_v23  ;;  %v447_v29 = vand.u32 (!%p341_p12), 4294901760, %v389_v16  ;;  %v445_v30 = vand.u32 (!%p341_p12), 4294901760, %v386_v17  ;;  %v449_v31 = vand.u32 (!%p341_p12), 4294901760, %v388_v23  ;;  %v1920_v45 = vld [vmem:[%s2943_s9] sm:$0x7] (!%p341_p12)  ;;  %s2890_s21 = scalar_lea.hbm (!%p341_p12), %s2944_s10, %s2103_s29 }
  0x23   : > { %414 = vperm.xlu1 (!%p341_p12), %2290, %v400_v26   ;;  %v435_v32 = vand.u32 (!%p341_p12), 4294901760, %v391_v21  ;;  %v439_v33 = vand.u32 (!%p341_p12), 4294901760, %v393_v22  ;;  %v437_v34 = vand.u32 (!%p341_p12), 4294901760, %v390_v24  ;;  %v2554_v35 = vand.u32 (!%p341_p12), 4294901760, %v433_v20  ;;  %v2096_v54 = vld [vmem:[%s2943_s9 + $0x4] sm:$0x7] (!%p341_p12) }
  0x24   : > { %v441_v37 = vand.u32 (!%p341_p12), 4294901760, %v392_v28  ;;  %v2559_v38 = vpack.c.bf16 (!%p341_p12), %v447_v29, %v443_v25  ;;  %v2561_v39 = vsub.f32 (!%p341_p12), %v387_v15, %v443_v25  ;;  %v2563_v40 = vsub.f32 (!%p341_p12), %v389_v16, %v447_v29  ;;  %s383_s30 = scalar_lea.vmem (!%p341_p12), [#allocation3], %s2068_s28  ;;  %s1981_s25 = scalar_lea.sflag (!%p341_p12), [#allocation4], %s2518_s12 }
  0x25   : > { %409 = vperm.xlu0 %2289, %v399_v27   ;;  %v2565_v41 = vpack.c.bf16 %v439_v33, %v435_v32  ;;  %v2567_v42 = vsub.f32 %v391_v21, %v435_v32  ;;  %v2569_v43 = vsub.f32 %v393_v22, %v439_v33  ;;  %v2571_v44 = vsub.f32 %v390_v24, %v437_v34  ;;  %s1995_s11 = sshll.u32 %s383_s30, 4  ;;  %s2405_s17 = smov [#allocation3]   ;;  %s2892_s11 = int_to_ptr.vmem [resolvable:$true] %s1995_s11 }
  0x26   : > { %v2576_v46 = vpack.c.bf16 %v441_v37, %v437_v34  ;;  %v2578_v47 = vsub.f32 %v392_v28, %v441_v37  ;;  %v2580_v48 = vpack.c.bf16 %v449_v31, %v445_v30  ;;  %v2582_v49 = vsub.f32 %v386_v17, %v445_v30  ;;  %s2339_s26 = scalar_lea.vmem %s2892_s11, 128  ;;  %s2343_s27 = sshll.u32 %s2405_s17, 4  ;;  %s2344_s27 = int_to_ptr.vmem [resolvable:$false] %s2343_s27 }
  0x27   : > { %419 = vperm.xlu1 %2290, %v401_v36   ;;  %2105 = vmatprep.subr.bf16.mxu0 %v2565_v41  ;;  %v2586_v50 = vsub.f32 %v424_v8, %v2538_v12  ;;  %v2589_v51 = vsub.f32 %v427_v9, %v2543_v18  ;;  %v554_v52 = vand.u32 4294901760, %v2567_v42  ;;  %v566_v53 = vand.u32 4294901760, %v2569_v43  ;;  %p2340_p13 = scmp.ne.s32.totalorder %s2892_s11, %s2339_s26  ;;  %s2345_s28 = scalar_lea.vmem %s2344_s27, 256 }
  0x28   : > { %2107 = vmatpush1.bf16.msra.mxu0 %v2576_v46  ;;  %v2597_v55 = vsub.f32 %v388_v23, %v449_v31  ;;  %v560_v56 = vand.u32 4294901760, %v2571_v44  ;;  %v572_v57 = vand.u32 4294901760, %v2578_v47  ;;  %v2602_v58 = vsub.f32 %v430_v10, %v2545_v19  ;;  %p2346_p2 = scmp.lt.s32.totalorder %s2892_s11, %s2344_s27  ;;  %p2347_p3 = scmp.lt.s32.totalorder %s2345_s28, %s2339_s26 }
  0x29   : > { %1931 = vperm.xlu0 %2289, %v1920_v45   ;;  %2109 = vmatprep.subr.bf16.mxu0 %v2559_v38  ;;  %v510_v59 = vand.u32 4294901760, %v2586_v50  ;;  %v521_v60 = vand.u32 4294901760, %v2589_v51  ;;  %v555_v61 = vsub.f32 %v2567_v42, %v554_v52  ;;  %v567_v62 = vsub.f32 %v2569_v43, %v566_v53  ;;  %p2341_p0 = pnand %p2340_p13, %p2499_p6 }
  0x2a   : > { %v561_v63 = vsub.f32 %v2571_v44, %v560_v56  ;;  %v573_v0 = vsub.f32 %v2578_v47, %v572_v57  ;;  %v532_v1 = vand.u32 4294901760, %v2602_v58  ;;  %v2621_v2 = vsub.f32 %v433_v20, %v2554_v35  ;;  %p2348_p4 = por %p2347_p3, %p2346_p2 }
  0x2b   : > { %1948 = vperm.xlu1 %2290, %v2096_v54   ;;  %v511_v3 = vsub.f32 %v2586_v50, %v510_v59  ;;  %v522_v4 = vsub.f32 %v2589_v51, %v521_v60  ;;  %v556_v5 = vand.u32 4294901760, %v555_v61  ;;  %v568_v6 = vand.u32 4294901760, %v567_v62  ;;  %p2342_p1 = pneg %p2341_p0 }
  0x2c   : > { %2111 = vmatpush1.bf16.msra.mxu0 %v2580_v48  ;;  %v562_v8 = vand.u32 4294901760, %v561_v63  ;;  %v574_v9 = vand.u32 4294901760, %v573_v0  ;;  %v578_v13 = vand.u32 4294901760, %v2561_v39  ;;  %v533_v15 = vsub.f32 %v2602_v58, %v532_v1 }
  0x2d   : > { %v512_v10 = vand.u32 4294901760, %v511_v3  ;;  %v2112_v11 = vpack.c.bf16 %v568_v6, %v556_v5  ;;  %v543_v16 = vand.u32 4294901760, %v2621_v2  ;;  %v590_v17 = vand.u32 4294901760, %v2563_v40  ;;  %p2349_p5 = pnand %p2348_p4, %p2342_p1 }
  0x2e   : > { %v2114_v14 = vpack.c.bf16 %v574_v9, %v562_v8  ;;  %v523_v20 = vand.u32 4294901760, %v522_v4  ;;  %v579_v21 = vsub.f32 %v2561_v39, %v578_v13  ;;  %v584_v22 = vand.u32 4294901760, %v2582_v49 }
  0x2f   : > { %513 = vmatmul.mubr.f32.vlgmr.msra.gmra.mrb[0].mxu0 %v512_v10  ;;  %2113 = vmatprep.subr.bf16.mxu0 %v2112_v11  ;;  %v596_v23 = vand.u32 4294901760, %v2597_v55  ;;  %v591_v24 = vsub.f32 %v2563_v40, %v590_v17  ;;  %v534_v29 = vand.u32 4294901760, %v533_v15  ;;  %v544_v30 = vsub.f32 %v2621_v2, %v543_v16 }
  0x30   : > { %518 = vmatprep.mubr.f32.mxu0 %v2403_v7  ;;  %2115 = vmatpush1.bf16.msra.mxu0 %v2114_v14  ;;  %v580_v25 = vand.u32 4294901760, %v579_v21  ;;  %v585_v26 = vsub.f32 %v2582_v49, %v584_v22  ;;  %v2120_v36 = vpack.c.bf16 %v2569_v43, %v2567_v42  ;;  %v2122_v45 = vpack.c.bf16 %v2578_v47, %v2571_v44 }
  0x31   : > { %v597_v27 = vsub.f32 %v2597_v55, %v596_v23  ;;  %v592_v28 = vand.u32 4294901760, %v591_v24  ;;  %v545_v37 = vand.u32 4294901760, %v544_v30  ;;  %v2124_v54 = vpack.c.bf16 %v2563_v40, %v2561_v39 }
  0x32   : > { %v586_v31 = vand.u32 4294901760, %v585_v26  ;;  %v2126_v61 = vpack.c.bf16 %v2597_v55, %v2582_v49  ;;  %v2136_v40 = vpack.c.bf16 %v566_v53, %v554_v52  ;;  %v2138_v42 = vpack.c.bf16 %v572_v57, %v560_v56 }
  0x33   : > { %524 = vmatmul.mubr.f32.gmra.mrb[2].mxu0 %v523_v20  ;;  %v598_v32 = vand.u32 4294901760, %v597_v27  ;;  %v2116_v33 = vpack.c.bf16 %v592_v28, %v580_v25  ;;  %v2140_v43 = vpack.c.bf16 %v590_v17, %v578_v13  ;;  %v2142_v49 = vpack.c.bf16 %v596_v23, %v584_v22 }
  0x34   : > { %529 = vmatprep.mubr.f32.mxu0 %v2403_v7  ;;  %vm1618_vm3 = vcmask 130048  }
  0x35   : > { %v2118_v34 = vpack.c.bf16 %v598_v32, %v586_v31  ;;  %2117 = vmatprep.subr.bf16.mxu0 %v2116_v33 }
  0x37   : > { %535 = vmatmul.mubr.f32.gmra.mrb[4].mxu0 %v534_v29 }
  0x38   : > { %540 = vmatprep.mubr.f32.mxu0 %v2403_v7  ;;  %2119 = vmatpush1.bf16.msra.mxu0 %v2118_v34 }
  0x39   : > { %2121 = vmatprep.subr.bf16.mxu0 %v2120_v36  ;;  %v1155_v36 = vld [vmem:[%s2937_s3] sm:$0xff] }
  0x3b   : > { %546 = vmatmul.mubr.f32.gmra.mrb[6].mxu0 %v545_v37  ;;  %v1156_v37 = vld [vmem:[%s2937_s3 + $0x8] sm:$0xff] }
  0x3c   : > { %656 = vmatprep.mubr.f32.mxu0 %v2403_v7 }
  0x3f   : > { %658 = vmatmul.mubr.f32.vlgmr.msra.gmra.mrb[0].mxu0 %v2538_v12 }
  0x40   : > { %663 = vmatprep.mubr.f32.mxu0 %v2403_v7  ;;  %2123 = vmatpush1.bf16.msra.mxu0 %v2122_v45  ;;  %v1157_v45 = vld [vmem:[%s2937_s3 + $0x10] sm:$0xff] }
  0x41   : > { %2125 = vmatprep.subr.bf16.mxu0 %v2124_v54  ;;  %v1158_v54 = vld [vmem:[%s2937_s3 + $0x18] sm:$0xff] }
  0x43   : > { %665 = vmatmul.mubr.f32.gmra.mrb[2].mxu0 %v2543_v18 }
  0x44   : > { %670 = vmatprep.mubr.f32.mxu0 %v2403_v7  ;;  %2127 = vmatpush1.bf16.msra.mxu0 %v2126_v61  ;;  %v1159_v61 = vld [vmem:[%s2937_s3 + $0x20] sm:$0xff] }
  0x45   : > { %2129 = vmatprep.subr.bf16.mxu0 %v2565_v41 }
  0x47   : > { %672 = vmatmul.mubr.f32.gmra.mrb[4].mxu0 %v2545_v19 }
  0x48   : > { %677 = vmatprep.mubr.f32.mxu0 %v2403_v7 }
  0x4b   : > { %679 = vmatmul.mubr.f32.gmra.mrb[6].mxu0 %v2554_v35 }
  0x4c   : > { %765 = vmatprep.mubr.f32.mxu0 %v2403_v7 }
  0x4f   : > { %768 = vmatmul.mubr.f32.vlgmr.msra.gmra.mrb[0].mxu0 %v2586_v50 }
  0x50   : > { %773 = vmatprep.mubr.f32.mxu0 %v2403_v7  ;;  %2131 = vmatpush1.bf16.msra.mxu0 %v2576_v46 }
  0x51   : > { %2133 = vmatprep.subr.bf16.mxu0 %v2559_v38 }
  0x53   : > { %776 = vmatmul.mubr.f32.gmra.mrb[2].mxu0 %v2589_v51 }
  0x54   : > { %781 = vmatprep.mubr.f32.mxu0 %v2403_v7  ;;  %2135 = vmatpush1.bf16.msra.mxu0 %v2580_v48 }
  0x55   : > { %2137 = vmatprep.subr.bf16.mxu0 %v2136_v40  ;;  %v1160_v40 = vld [vmem:[%s2937_s3 + $0x28] sm:$0xff] }
  0x57   : > { %784 = vmatmul.mubr.f32.gmra.mrb[4].mxu0 %v2602_v58 }
  0x58   : > { %789 = vmatprep.mubr.f32.mxu0 %v2403_v7 }
  0x5b   : > { %792 = vmatmul.mubr.f32.gmra.mrb[6].mxu0 %v2621_v2 }
  0x5c   : > { %870 = vmatprep.mubr.f32.mxu0 %v2403_v7 }
  0x5f   : > { %874 = vmatmul.mubr.f32.vlgmr.msra.gmra.mrb[0].mxu0 %v510_v59 }
  0x60   : > { %879 = vmatprep.mubr.f32.mxu0 %v2403_v7  ;;  %2139 = vmatpush1.bf16.msra.mxu0 %v2138_v42  ;;  %v1161_v42 = vld [vmem:[%s2937_s3 + $0x30] sm:$0xff] }
  0x61   : > { %2141 = vmatprep.subr.bf16.mxu0 %v2140_v43  ;;  %v1162_v43 = vld [vmem:[%s2937_s3 + $0x38] sm:$0xff] }
  0x63   : > { %883 = vmatmul.mubr.f32.gmra.mrb[2].mxu0 %v521_v60 }
  0x64   : > { %888 = vmatprep.mubr.f32.mxu0 %v2403_v7  ;;  %2143 = vmatpush1.bf16.msra.mxu0 %v2142_v49  ;;  %v1300_v49 = vld [vmem:[%s2938_s4] sm:$0xff] }
  0x65   : > { %2145 = vmatprep.subr.bf16.mxu0 %v2565_v41 }
  0x67   : > { %892 = vmatmul.mubr.f32.gmra.mrb[4].mxu0 %v532_v1 }
  0x68   : > { %897 = vmatprep.mubr.f32.mxu0 %v2403_v7 }
  0x6b   : > { %901 = vmatmul.mubr.f32.gmra.mrb[6].mxu0 %v543_v16 }
  0x6c   : > { %995 = vmatprep.mubr.f32.mxu0 %v2403_v7 }
  0x6f   : > { %997 = vmatmul.mubr.f32.vlgmr.msra.gmra.mrb[0].mxu0 %v2538_v12 }
  0x70   : > { %1002 = vmatprep.mubr.f32.mxu0 %v2403_v7  ;;  %2147 = vmatpush1.bf16.msra.mxu0 %v2576_v46 }
  0x71   : > { %2149 = vmatprep.subr.bf16.mxu0 %v2559_v38 }
  0x73   : > { %1004 = vmatmul.mubr.f32.gmra.mrb[2].mxu0 %v2543_v18 }
  0x74   : > { %1009 = vmatprep.mubr.f32.mxu0 %v2403_v7  ;;  %2151 = vmatpush1.bf16.msra.mxu0 %v2580_v48 }
  0x77   : > { %1011 = vmatmul.mubr.f32.gmra.mrb[4].mxu0 %v2545_v19 }
  0x78   : > { %1016 = vmatprep.mubr.f32.mxu0 %v2403_v7 }
  0x7b   : > { %1018 = vmatmul.mubr.f32.gmra.mrb[6].mxu0 %v2554_v35 }
  0x7c   : > { %1096 = vmatprep.mubr.f32.mxu0 %v2403_v7 }
  0x7f   : > { %1098 = vmatmul.mubr.f32.vlgmr.msra.gmra.mrb[0].mxu0 %v2538_v12 }
  0x80   : > { %1103 = vmatprep.mubr.f32.mxu0 %v2403_v7 }
  0x83   : > { %1105 = vmatmul.mubr.f32.gmra.mrb[2].mxu0 %v2543_v18 }
  0x84   : > { %1110 = vmatprep.mubr.f32.mxu0 %v2403_v7 }
  0x87   : > { %1112 = vmatmul.mubr.f32.gmra.mrb[4].mxu0 %v2545_v19 }
  0x88   : > { %1117 = vmatprep.mubr.f32.mxu0 %v2403_v7 }
  0x8b   : > { %1119 = vmatmul.mubr.f32.gmra.mrb[6].mxu0 %v2554_v35 }
  0x8c   : > { %1901 = vmatprep.mubr.f32.mxu0 %v2403_v7 }
  0xa0   : > { %v405_v38 = vpop.permute.xlu0 %404 }
  0xa2   : > { %v415_v50 = vpop.permute.xlu1 %414 }
  0xa4   : > { %v410_v44 = vpop.permute.xlu0 %409 }
  0xa6   : > { %v420_v58 = vpop.permute.xlu1 %419 }
 0x152   : > { %v1099_v39 = vpop.f32.mrb[0].mxu0 }
 0x153   : > { %v1101_v41 = vpop.f32.mrb[1].mxu0  ;;  %v2200_v12 = vadd.f32 %v1099_v39, %v405_v38  ;;  %v1302_v39 = vld [vmem:[%s2938_s4 + $0x10] sm:$0xff] }
 0x154   : > { %v2201_v18 = vadd.f32 %v1101_v41, %v405_v38  ;;  %v1301_v38 = vld [vmem:[%s2938_s4 + $0x8] sm:$0xff]  ;;  %v1303_v41 = vld [vmem:[%s2938_s4 + $0x18] sm:$0xff] }
 0x156   : > { %v1106_v46 = vpop.f32.mrb[2].mxu0 }
 0x157   : > { %v2202_v47 = vadd.f32 %v1106_v46, %v410_v44  ;;  %v1108_v48 = vpop.f32.mrb[3].mxu0  ;;  %v1305_v46 = vld [vmem:[%s2938_s4 + $0x28] sm:$0xff] }
 0x158   : > { %v2203_v51 = vadd.f32 %v1108_v48, %v410_v44  ;;  %v1304_v44 = vld [vmem:[%s2938_s4 + $0x20] sm:$0xff] }
 0x159   : > { %v1125_v52 = vmax.f32 %v2200_v12, %v2202_v47 }
 0x15a   : > { %v1126_v53 = vmax.f32 %v2201_v18, %v2203_v51  ;;  %v1113_v19 = vpop.f32.mrb[4].mxu0 }
 0x15b   : > { %v2204_v55 = vadd.f32 %v1113_v19, %v415_v50  ;;  %v1115_v56 = vpop.f32.mrb[5].mxu0 }
 0x15c   : > { %v2205_v57 = vadd.f32 %v1115_v56, %v415_v50 }
 0x15d   : > { %v1127_v35 = vmax.f32 %v1125_v52, %v2204_v55 }
 0x15e   : > { %v1128_v59 = vmax.f32 %v1126_v53, %v2205_v57  ;;  %v1120_v60 = vpop.f32.mrb[6].mxu0 }
 0x15f   : > { %v2206_v62 = vadd.f32 %v1120_v60, %v420_v58  ;;  %v1122_v63 = vpop.f32.mrb[7].mxu0 }
 0x160   : > { %v2207_v0 = vadd.f32 %v1122_v63, %v420_v58 }
 0x161   : > { %v2721_v1 = vmax.f32 %v1127_v35, %v2206_v62 }
 0x162   : > { %v2723_v2 = vmax.f32 %v1128_v59, %v2207_v0 }
 0x163   : > { %v1137_v3 = vsub.f32 %v2206_v62, %v2721_v1  ;;  %v1131_v4 = vsub.f32 %v2200_v12, %v2721_v1  ;;  %v1133_v5 = vsub.f32 %v2202_v47, %v2721_v1  ;;  %v1135_v6 = vsub.f32 %v2204_v55, %v2721_v1  ;;  %v1306_v12 = vld [vmem:[%s2938_s4 + $0x30] sm:$0xff]  ;;  %v1307_v47 = vld [vmem:[%s2938_s4 + $0x38] sm:$0xff] }
 0x164   : > { %v1138_v8 = vsub.f32 %v2207_v0, %v2723_v2  ;;  %v1132_v9 = vsub.f32 %v2201_v18, %v2723_v2  ;;  %v1134_v10 = vsub.f32 %v2203_v51, %v2723_v2  ;;  %v1136_v11 = vsub.f32 %v2205_v57, %v2723_v2 }
 0x165   : > { %v1151_v13 = vmul.f32 1.442695, %v1137_v3  ;;  %v1139_v17 = vmul.f32 1.442695, %v1131_v4  ;;  %v1143_v20 = vmul.f32 1.442695, %v1133_v5 }
 0x166   : > { %v1153_v14 = vmul.f32 1.442695, %v1138_v8  ;;  %v1141_v15 = vmul.f32 1.442695, %v1132_v9  ;;  %v1145_v16 = vmul.f32 1.442695, %v1134_v10 }
 0x167   : > { %2291 = vpow2.f32 %v1151_v13  ;;  %v1149_v21 = vmul.f32 1.442695, %v1136_v11  ;;  %v1147_v22 = vmul.f32 1.442695, %v1135_v6 }
 0x168   : > { %2293 = vpow2.f32 %v1153_v14 }
 0x169   : > { %2295 = vpow2.f32 %v1141_v15 }
 0x16a   : > { %2297 = vpow2.f32 %v1145_v16 }
 0x16b   : > { %2299 = vpow2.f32 %v1139_v17 }
 0x16c   : > { %2301 = vpow2.f32 %v1143_v20 }
 0x16d   : > { %2303 = vpow2.f32 %v1149_v21 }
 0x16e   : > { %2305 = vpow2.f32 %v1147_v22 }
 0x171   : > { %v2292_v23 = vpop.eup %2291 }
 0x172   : > { %v2294_v24 = vpop.eup %2293 }
 0x173   : > { %v2296_v25 = vpop.eup %2295 }
 0x174   : > { %v2298_v26 = vpop.eup %2297 }
 0x175   : > { %v2300_v27 = vpop.eup %2299  ;;  %v2152_v28 = vpack.c.bf16 %v2298_v26, %v2296_v25 }
 0x176   : > { %v2302_v29 = vpop.eup %2301 }
 0x177   : > { %v2304_v30 = vpop.eup %2303  ;;  %2153 = vmatprep.subr.bf16.mxu1 %v2152_v28  ;;  %v2154_v31 = vpack.c.bf16 %v2302_v29, %v2300_v27 }
 0x178   : > { %v2306_v32 = vpop.eup %2305  ;;  %v2156_v33 = vpack.c.bf16 %v2294_v24, %v2304_v30 }
 0x179   : > { %2155 = vmatpush1.bf16.msra.mxu1 %v2154_v31  ;;  %v2158_v34 = vpack.c.bf16 %v2292_v23, %v2306_v32 }
 0x17a   : > { %2157 = vmatprep.subr.bf16.mxu1 %v2156_v33 }
 0x17d   : > { %2159 = vmatpush1.bf16.msra.mxu1 %v2158_v34 }
 0x17e   : > { %2161 = vmatprep.subr.bf16.mxu1 %v2152_v28 }
 0x180   : > { %2069 = vmatmul.mubr.msk.f32.vlgmr.msra.gmra.mrb[0].mxu1 %vm422_vm0, %v1155_v36 }
 0x181   : > { %2163 = vmatpush1.bf16.msra.mxu1 %v2154_v31  ;;  %1257 = vmatprep.mubr.f32.mxu1 %v2403_v7 }
 0x182   : > { %2165 = vmatprep.subr.bf16.mxu1 %v2156_v33 }
 0x184   : > { %2070 = vmatmul.mubr.msk.f32.gmra.mrb[2].mxu1 %vm422_vm0, %v1156_v37 }
 0x185   : > { %2167 = vmatpush1.bf16.msra.mxu1 %v2158_v34  ;;  %1263 = vmatprep.mubr.f32.mxu1 %v2403_v7 }
 0x188   : > { %2071 = vmatmul.mubr.msk.f32.gmra.mrb[4].mxu1 %vm422_vm0, %v1157_v45 }
 0x189   : > { %1269 = vmatprep.mubr.f32.mxu1 %v2403_v7 }
 0x18c   : > { %2072 = vmatmul.mubr.msk.f32.gmra.mrb[6].mxu1 %vm422_vm0, %v1158_v54 }
 0x18d   : > { %1275 = vmatprep.mubr.f32.mxu1 %v2403_v7 }
 0x190   : > { %2073 = vmatmul.mubr.msk.f32.gmra.mrb[8].mxu1 %vm422_vm0, %v1159_v61 }
 0x191   : > { %1281 = vmatprep.mubr.f32.mxu1 %v2403_v7 }
 0x194   : > { %2074 = vmatmul.mubr.msk.f32.gmra.mrb[10].mxu1 %vm422_vm0, %v1160_v40 }
 0x195   : > { %1287 = vmatprep.mubr.f32.mxu1 %v2403_v7 }
 0x198   : > { %2075 = vmatmul.mubr.msk.f32.gmra.mrb[12].mxu1 %vm422_vm0, %v1161_v42 }
 0x199   : > { %1293 = vmatprep.mubr.f32.mxu1 %v2403_v7 }
 0x19c   : > { %2076 = vmatmul.mubr.msk.f32.gmra.mrb[14].mxu1 %vm422_vm0, %v1162_v43 }
 0x19d   : > { %1396 = vmatprep.mubr.f32.mxu1 %v2403_v7 }
 0x1a0   : > { %2077 = vmatmul.mubr.msk.f32.vlgmr.msra.gmra.mrb[16].mxu1 %vm422_vm0, %v1300_v49 }
 0x1a1   : > { %1402 = vmatprep.mubr.f32.mxu1 %v2403_v7 }
 0x1a4   : > { %2078 = vmatmul.mubr.msk.f32.gmra.mrb[18].mxu1 %vm422_vm0, %v1301_v38 }
 0x1a5   : > { %1408 = vmatprep.mubr.f32.mxu1 %v2403_v7 }
 0x1a8   : > { %2079 = vmatmul.mubr.msk.f32.gmra.mrb[20].mxu1 %vm422_vm0, %v1302_v39 }
 0x1a9   : > { %1414 = vmatprep.mubr.f32.mxu1 %v2403_v7 }
 0x1ac   : > { %2080 = vmatmul.mubr.msk.f32.gmra.mrb[22].mxu1 %vm422_vm0, %v1303_v41  ;;  %v1461_v41 = vld [vmem:[%s2939_s5] sm:$0xff] }
 0x1ad   : > { %1420 = vmatprep.mubr.f32.mxu1 %v2403_v7 }
 0x1b0   : > { %2081 = vmatmul.mubr.msk.f32.gmra.mrb[24].mxu1 %vm422_vm0, %v1304_v44  ;;  %v1462_v44 = vld [vmem:[%s2939_s5 + $0x8] sm:$0xff] }
 0x1b1   : > { %1426 = vmatprep.mubr.f32.mxu1 %v2403_v7 }
 0x1b4   : > { %2082 = vmatmul.mubr.msk.f32.gmra.mrb[26].mxu1 %vm422_vm0, %v1305_v46 }
 0x1b5   : > { %1432 = vmatprep.mubr.f32.mxu1 %v2403_v7 }
 0x1b8   : > { %2083 = vmatmul.mubr.msk.f32.gmra.mrb[28].mxu1 %vm422_vm0, %v1306_v12  ;;  %v1549_v12 = vrot.slane %v2721_v1, 4 }
 0x1b9   : > { %1438 = vmatprep.mubr.f32.mxu1 %v2403_v7 }
 0x1bc   : > { %2084 = vmatmul.mubr.msk.f32.gmra.mrb[30].mxu1 %vm422_vm0, %v1307_v47 }
 0x1bd   : > { %1534 = vmatprep.mubr.f32.mxu1 %v2403_v7 }
 0x253   : > { %v1253_v48 = vpop.f32.mrb[0].mxu1 }
 0x254   : > { %v1255_v50 = vpop.f32.mrb[1].mxu1 }
 0x257   : > { %v1259_v18 = vpop.f32.mrb[2].mxu1 }
 0x258   : > { %v1261_v51 = vpop.f32.mrb[3].mxu1 }
 0x25b   : > { %v1265_v52 = vpop.f32.mrb[4].mxu1 }
 0x25c   : > { %v1267_v53 = vpop.f32.mrb[5].mxu1 }
 0x25f   : > { %v1271_v19 = vpop.f32.mrb[6].mxu1 }
 0x260   : > { %v1273_v55 = vpop.f32.mrb[7].mxu1 }
 0x263   : > { %v1277_v56 = vpop.f32.mrb[8].mxu1 }
 0x264   : > { %v1279_v57 = vpop.f32.mrb[9].mxu1 }
 0x267   : > { %v1283_v35 = vpop.f32.mrb[10].mxu1 }
 0x268   : > { %v1285_v58 = vpop.f32.mrb[11].mxu1 }
 0x26b   : > { %v1289_v59 = vpop.f32.mrb[12].mxu1 }
 0x26c   : > { %v1291_v60 = vpop.f32.mrb[13].mxu1 }
 0x26f   : > { %v1295_v62 = vpop.f32.mrb[14].mxu1 }
 0x270   : > { %v1297_v63 = vpop.f32.mrb[15].mxu1 }
 0x273   : > { %v1398_v0 = vpop.f32.mrb[16].mxu1 }
 0x274   : > { %v1445_v3 = vmul.f32 %v1398_v0, %v1253_v48  ;;  %v1400_v4 = vpop.f32.mrb[17].mxu1  ;;  %v1550_v48 = vrot.slane %v2723_v2, 4 }
 0x275   : > { %v1446_v5 = vmul.f32 %v1400_v4, %v1255_v50 }
 0x277   : > { %v1404_v6 = vpop.f32.mrb[18].mxu1 }
 0x278   : > { %v1447_v8 = vmul.f32 %v1404_v6, %v1259_v18  ;;  %v1406_v9 = vpop.f32.mrb[19].mxu1  ;;  %v1553_v18 = vadd.f32 %v1549_v12, %v2721_v1 }
 0x279   : > { %v1448_v10 = vmul.f32 %v1406_v9, %v1261_v51 }
 0x27a   : > { %v2170_v11 = vpack.c.bf16 %v1447_v8, %v1445_v3 }
 0x27b   : > { %v2168_v13 = vpack.c.bf16 %v1448_v10, %v1446_v5  ;;  %v1410_v14 = vpop.f32.mrb[20].mxu1 }
 0x27c   : > { %v1449_v15 = vmul.f32 %v1410_v14, %v1265_v52  ;;  %v1412_v16 = vpop.f32.mrb[21].mxu1  ;;  %v1554_v52 = vadd.f32 %v1550_v48, %v2723_v2 }
 0x27d   : > { %v1450_v17 = vmul.f32 %v1412_v16, %v1267_v53  ;;  %2169 = vmatprep.subr.bf16.mxu1 %v2168_v13  ;;  %v1565_v53 = vrot.slane %v1553_v18, 4 }
 0x27e   : > { %2171 = vmatpush1.bf16.msra.mxu1 %v2170_v11 }
 0x27f   : > { %v1416_v20 = vpop.f32.mrb[22].mxu1 }
 0x280   : > { %v1451_v21 = vmul.f32 %v1416_v20, %v1271_v19  ;;  %v1418_v22 = vpop.f32.mrb[23].mxu1  ;;  %v1566_v19 = vrot.slane %v1554_v52, 4 }
 0x281   : > { %v1452_v23 = vmul.f32 %v1418_v22, %v1273_v55 }
 0x282   : > { %v2174_v24 = vpack.c.bf16 %v1451_v21, %v1449_v15 }
 0x283   : > { %v2172_v25 = vpack.c.bf16 %v1452_v23, %v1450_v17  ;;  %v1422_v26 = vpop.f32.mrb[24].mxu1 }
 0x284   : > { %v1453_v27 = vmul.f32 %v1422_v26, %v1277_v56  ;;  %v1424_v28 = vpop.f32.mrb[25].mxu1 }
 0x285   : > { %v1454_v29 = vmul.f32 %v1424_v28, %v1279_v57  ;;  %2173 = vmatprep.subr.bf16.mxu1 %v2172_v25 }
 0x286   : > { %2175 = vmatpush1.bf16.msra.mxu1 %v2174_v24 }
 0x287   : > { %v1428_v30 = vpop.f32.mrb[26].mxu1 }
 0x288   : > { %v1455_v31 = vmul.f32 %v1428_v30, %v1283_v35  ;;  %v1430_v32 = vpop.f32.mrb[27].mxu1  ;;  %v1570_v35 = vsel %vm1569_vm2, %v1553_v18, %v1565_v53 }
 0x289   : > { %v1456_v33 = vmul.f32 %v1430_v32, %v1285_v58 }
 0x28a   : > { %v2178_v34 = vpack.c.bf16 %v1455_v31, %v1453_v27 }
 0x28b   : > { %v2176_v36 = vpack.c.bf16 %v1456_v33, %v1454_v29  ;;  %v1434_v37 = vpop.f32.mrb[28].mxu1 }
 0x28c   : > { %v1457_v45 = vmul.f32 %v1434_v37, %v1289_v59  ;;  %v1436_v54 = vpop.f32.mrb[29].mxu1 }
 0x28d   : > { %v1458_v61 = vmul.f32 %v1436_v54, %v1291_v60  ;;  %2177 = vmatprep.subr.bf16.mxu1 %v2176_v36  ;;  %v1571_v60 = vsel %vm1569_vm2, %v1554_v52, %v1566_v19  ;;  %v1615_v54 = vld [vmem:[%s2940_s6 + $0x8] sm:$0xff] }
 0x28e   : > { %2179 = vmatpush1.bf16.msra.mxu1 %v2178_v34 }
 0x28f   : > { %v1440_v40 = vpop.f32.mrb[30].mxu1 }
 0x290   : > { %v1459_v42 = vmul.f32 %v1440_v40, %v1295_v62  ;;  %v1442_v43 = vpop.f32.mrb[31].mxu1  ;;  %v1617_v40 = vld [vmem:[%s2940_s6 + $0x18] sm:$0xff] }
 0x291   : > { %v1460_v49 = vmul.f32 %v1442_v43, %v1297_v63  ;;  %v1721_v43 = vld [vmem:[%s2941_s7 + $0x8] sm:$0xff] }
 0x292   : > { %v2182_v38 = vpack.c.bf16 %v1459_v42, %v1457_v45  ;;  %v1614_v45 = vld [vmem:[%s2940_s6] sm:$0xff] }
 0x293   : > { %v2180_v39 = vpack.c.bf16 %v1460_v49, %v1458_v61  ;;  %v1616_v61 = vld [vmem:[%s2940_s6 + $0x10] sm:$0xff]  ;;  %v1720_v42 = vld [vmem:[%s2941_s7] sm:$0xff] }
 0x294   : > { %v1722_v49 = vld [vmem:[%s2941_s7 + $0x10] sm:$0xff] }
 0x295   : > { %2181 = vmatprep.subr.bf16.mxu1 %v2180_v39 }
 0x296   : > { %2183 = vmatpush1.bf16.msra.mxu1 %v2182_v38  ;;  %v1723_v38 = vld [vmem:[%s2941_s7 + $0x18] sm:$0xff] }
 0x299   : > { %2085 = vmatmul.mubr.msk.f32.vlgmr.msra.gmra.mrb[32].mxu1 %vm1463_vm1, %v1461_v41 }
 0x29a   : > { %1540 = vmatprep.mubr.f32.mxu1 %v2403_v7 }
 0x29d   : > { %2086 = vmatmul.mubr.msk.f32.gmra.mrb[34].mxu1 %vm1463_vm1, %v1462_v44 }
 0x29e   : > { %1695 = vmatprep.mubr.f32.mxu1 %v2403_v7 }
 0x36c   : > { %v1536_v46 = vpop.f32.mrb[32].mxu1 }
 0x36d   : > { %2307 = vlog2.f32 %v1536_v46  ;;  %v1538_v47 = vpop.f32.mrb[33].mxu1 }
 0x36e   : > { %2309 = vlog2.f32 %v1538_v47 }
 0x370   : > { %v1542_v50 = vpop.f32.mrb[34].mxu1 }
 0x371   : > { %2311 = vlog2.f32 %v1542_v50  ;;  %v1544_v51 = vpop.f32.mrb[35].mxu1 }
 0x372   : > { %2313 = vlog2.f32 %v1544_v51 }
 0x377   : > { %v2308_v55 = vpop.eup %2307 }
 0x378   : > { %v2310_v56 = vpop.eup %2309  ;;  %v1556_v57 = vmul.f32 0.6931472, %v2308_v55 }
 0x379   : > { %v1558_v58 = vmul.f32 0.6931472, %v2310_v56 }
 0x37a   : > { %v1572_v59 = vadd.f32 %v1570_v35, %v1556_v57 }
 0x37b   : > { %v2312_v62 = vpop.eup %2311  ;;  %v1573_v63 = vadd.f32 %v1571_v60, %v1558_v58 }
 0x37c   : > { %v2314_v1 = vpop.eup %2313  ;;  %v1578_v0 = vrot.slane %v1572_v59, 4  ;;  %v1560_v3 = vmul.f32 0.6931472, %v2312_v62 }
 0x37d   : > { %v1579_v4 = vrot.slane %v1573_v63, 4  ;;  %v1562_v2 = vmul.f32 0.6931472, %v2314_v1 }
 0x37e   : > { %v1582_v5 = vmax.f32 %v1572_v59, %v1578_v0  ;;  %v1574_v6 = vadd.f32 %v1570_v35, %v1560_v3 }
 0x37f   : > { %v1583_v8 = vmax.f32 %v1573_v63, %v1579_v4  ;;  %v1575_v9 = vadd.f32 %v1571_v60, %v1562_v2 }
 0x380   : > { %v1584_v10 = vmax.f32 %v1582_v5, %v1574_v6  ;;  %v1588_v11 = vrot.slane %v1574_v6, 4  ;;  %v1833_v5 = vld [vmem:[%s2942_s8] sm:$0x3] }
 0x381   : > { %v1585_v13 = vmax.f32 %v1583_v8, %v1575_v9  ;;  %v1589_v14 = vrot.slane %v1575_v9, 4 }
 0x382   : > { %v2827_v15 = vmax.f32 %v1584_v10, %v1588_v11 }
 0x383   : > { %v2829_v16 = vmax.f32 %v1585_v13, %v1589_v14 }
 0x384   : > { %v1596_v17 = vrot.slane %v2827_v15, 4  ;;  %v1912_v10 = vrot.slane %v2827_v15, 2 }
 0x385   : > { %v1597_v20 = vrot.slane %v2829_v16, 4  ;;  %v1913_v13 = vrot.slane %v2829_v16, 2 }
 0x386   : > { %v1600_v21 = vsel %vm1569_vm2, %v2827_v15, %v1596_v17 }
 0x387   : > { %v1602_v22 = vsub.f32 %v1572_v59, %v1600_v21  ;;  %v1604_v23 = vsub.f32 %v1574_v6, %v1600_v21  ;;  %v1601_v24 = vsel %vm1569_vm2, %v2829_v16, %v1597_v20  ;;  %v1916_v21 = vadd.f32 %v1912_v10, %v2827_v15 }
 0x388   : > { %v1603_v25 = vsub.f32 %v1573_v63, %v1601_v24  ;;  %v1605_v26 = vsub.f32 %v1575_v9, %v1601_v24  ;;  %v1921_v9 = vlaneseq }
 0x389   : > { %v1606_v27 = vmul.f32 1.442695, %v1602_v22  ;;  %v1610_v28 = vmul.f32 1.442695, %v1604_v23 }
 0x38a   : > { %v1608_v29 = vmul.f32 1.442695, %v1603_v25  ;;  %v1612_v30 = vmul.f32 1.442695, %v1605_v26  ;;  %v1922_v11 = vshrl.u32 %v1921_v9, 7  ;;  %v1917_v25 = vadd.f32 %v1913_v13, %v2829_v16 }
 0x38b   : > { %2315 = vpow2.f32 %v1606_v27 }
 0x38c   : > { %2317 = vpow2.f32 %v1610_v28  ;;  %v1923_v22 = vsub.s32 0, %v1922_v11  ;;  %v1940_v23 = vsub.s32 1, %v1922_v11 }
 0x38d   : > { %2319 = vpow2.f32 %v1608_v29 }
 0x38e   : > { %2321 = vpow2.f32 %v1612_v30  ;;  %v1932_v30 = vpop.permute.xlu0 %1931 }
 0x395   : > { %v2316_v31 = vpop.eup %2315 }
 0x396   : > { %v2318_v32 = vpop.eup %2317 }
 0x397   : > { %v2320_v33 = vpop.eup %2319  ;;  %v2186_v34 = vpack.c.bf16 %v2318_v32, %v2316_v31  ;;  %v1949_v31 = vpop.permute.xlu1 %1948 }
 0x398   : > { %v2322_v36 = vpop.eup %2321 }
 0x399   : > { %v2184_v37 = vpack.c.bf16 %v2322_v36, %v2320_v33 }
 0x39b   : > { %2185 = vmatprep.subr.bf16.mxu1 %v2184_v37 }
 0x39c   : > { %2187 = vmatpush1.bf16.msra.mxu1 %v2186_v34 }
 0x39d   : > { %2189 = vmatprep.subr.bf16.mxu1 %v2184_v37 }
 0x39f   : > { %2087 = vmatmul.mubr.msk.f32.vlgmr.msra.gmra.mrb[36].mxu1 %vm1618_vm3, %v1614_v45 }
 0x3a0   : > { %2191 = vmatpush1.bf16.msra.mxu1 %v2186_v34  ;;  %1701 = vmatprep.mubr.f32.mxu1 %v2403_v7 }
 0x3a3   : > { %2088 = vmatmul.mubr.msk.f32.gmra.mrb[38].mxu1 %vm1618_vm3, %v1615_v54 }
 0x3a4   : > { %1707 = vmatprep.mubr.f32.mxu1 %v2403_v7 }
 0x3a7   : > { %2089 = vmatmul.mubr.msk.f32.gmra.mrb[40].mxu1 %vm1618_vm3, %v1616_v61 }
 0x3a8   : > { %1713 = vmatprep.mubr.f32.mxu1 %v2403_v7 }
 0x3ab   : > { %2090 = vmatmul.mubr.msk.f32.gmra.mrb[42].mxu1 %vm1618_vm3, %v1617_v40 }
 0x3ac   : > { %1800 = vmatprep.mubr.f32.mxu1 %v2403_v7 }
 0x3af   : > { %2091 = vmatmul.mubr.msk.f32.vlgmr.msra.gmra.mrb[44].mxu1 %vm1618_vm3, %v1720_v42 }
 0x3b0   : > { %1806 = vmatprep.mubr.f32.mxu1 %v2403_v7 }
 0x3b3   : > { %2092 = vmatmul.mubr.msk.f32.gmra.mrb[46].mxu1 %vm1618_vm3, %v1721_v43 }
 0x3b4   : > { %1812 = vmatprep.mubr.f32.mxu1 %v2403_v7 }
 0x3b7   : > { %2093 = vmatmul.mubr.msk.f32.gmra.mrb[48].mxu1 %vm1618_vm3, %v1722_v49 }
 0x3b8   : > { %1818 = vmatprep.mubr.f32.mxu1 %v2403_v7 }
 0x3bb   : > { %2094 = vmatmul.mubr.msk.f32.gmra.mrb[50].mxu1 %vm1618_vm3, %v1723_v38 }
 0x472   : > { %v1697_v39 = vpop.f32.mrb[36].mxu1 }
 0x473   : > { %v1699_v41 = vpop.f32.mrb[37].mxu1 }
 0x476   : > { %v1703_v44 = vpop.f32.mrb[38].mxu1 }
 0x477   : > { %v1705_v46 = vpop.f32.mrb[39].mxu1 }
 0x47a   : > { %v1709_v12 = vpop.f32.mrb[40].mxu1 }
 0x47b   : > { %v1711_v47 = vpop.f32.mrb[41].mxu1 }
 0x47e   : > { %v1715_v48 = vpop.f32.mrb[42].mxu1 }
 0x47f   : > { %v1717_v50 = vpop.f32.mrb[43].mxu1 }
 0x482   : > { %v1802_v18 = vpop.f32.mrb[44].mxu1 }
 0x483   : > { %v1825_v51 = vmul.f32 %v1802_v18, %v1697_v39  ;;  %v1804_v52 = vpop.f32.mrb[45].mxu1 }
 0x484   : > { %v1826_v53 = vmul.f32 %v1804_v52, %v1699_v41 }
 0x486   : > { %v1808_v19 = vpop.f32.mrb[46].mxu1 }
 0x487   : > { %v1827_v7 = vmul.f32 %v1808_v19, %v1703_v44  ;;  %v1810_v55 = vpop.f32.mrb[47].mxu1 }
 0x488   : > { %v1828_v56 = vmul.f32 %v1810_v55, %v1705_v46 }
 0x489   : > { %v2194_v57 = vpack.c.bf16 %v1827_v7, %v1825_v51 }
 0x48a   : > { %v2192_v35 = vpack.c.bf16 %v1828_v56, %v1826_v53  ;;  %v1814_v58 = vpop.f32.mrb[48].mxu1 }
 0x48b   : > { %v1829_v59 = vmul.f32 %v1814_v58, %v1709_v12  ;;  %v1816_v60 = vpop.f32.mrb[49].mxu1 }
 0x48c   : > { %v1830_v62 = vmul.f32 %v1816_v60, %v1711_v47  ;;  %2193 = vmatprep.subr.bf16.mxu0 %v2192_v35 }
 0x48d   : > { %2195 = vmatpush1.bf16.msra.mxu0 %v2194_v57 }
 0x48e   : > { %v1820_v63 = vpop.f32.mrb[50].mxu1 }
 0x48f   : > { %v1831_v1 = vmul.f32 %v1820_v63, %v1715_v48  ;;  %v1822_v0 = vpop.f32.mrb[51].mxu1 }
 0x490   : > { %v1832_v3 = vmul.f32 %v1822_v0, %v1717_v50 }
 0x491   : > { %v2198_v4 = vpack.c.bf16 %v1831_v1, %v1829_v59 }
 0x492   : > { %v2196_v2 = vpack.c.bf16 %v1832_v3, %v1830_v62 }
 0x494   : > { %2197 = vmatprep.subr.bf16.mxu0 %v2196_v2 }
 0x495   : > { %2199 = vmatpush1.bf16.msra.mxu0 %v2198_v4 }
 0x498   : > { %2095 = vmatmul.mubr.msk.f32.vlgmr.msra.gmra.mrb[8].mxu0 %vm422_vm0, %v1833_v5 }
 0x56b   : > { %v1903_v6 = vpop.f32.mrb[8].mxu0 }
 0x56c   : > { %2323 = vlog2.f32 %v1903_v6  ;;  %v1905_v8 = vpop.f32.mrb[9].mxu0 }
 0x56d   : > { %2325 = vlog2.f32 %v1905_v8 }
 0x576   : > { %v2324_v14 = vpop.eup %2323 }
 0x577   : > { %v2326_v17 = vpop.eup %2325  ;;  %v1909_v20 = vmul.f32 0.6931472, %v2324_v14 }
 0x578   : > { %v1911_v24 = vmul.f32 0.6931472, %v2326_v17 }
 0x579   : > { %v1918_v26 = vadd.f32 %v1916_v21, %v1909_v20 }
 0x57a   : > { %v1919_v27 = vadd.f32 %v1917_v25, %v1911_v24 }
 0x57b   : > { %v1924_v28 = vrot.slane %v1918_v26, %v1923_v22  ;;  %v1941_v29 = vrot.slane %v1918_v26, %v1940_v23 }
 0x57c   : > { %v1928_v32 = vrot.slane %v1919_v27, %v1923_v22  ;;  %v1945_v33 = vrot.slane %v1919_v27, %v1940_v23 }
 0x57d   : > { %v1934_v34 = vadd.f32 %v1932_v30, %v1924_v28  ;;  %v1951_v36 = vadd.f32 %v1949_v31, %v1941_v29 }
 0x57e   : > { %v1935_v37 = vadd.f32 %v1932_v30, %v1928_v32  ;;  %v1952_v45 = vadd.f32 %v1949_v31, %v1945_v33 }
 0x57f   : > { %v1953_v54 = vmax.f32 %v1934_v34, %v1951_v36 }
 0x580   : > { %v1954_v61 = vmax.f32 %v1935_v37, %v1952_v45 }
 0x581   : > { %v1955_v15 = vsub.f32 %v1934_v34, %v1953_v54  ;;  %v1961_v40 = vsub.f32 %v1951_v36, %v1953_v54 }
 0x582   : > { %v1956_v42 = vsub.f32 %v1935_v37, %v1954_v61  ;;  %v1962_v43 = vsub.f32 %v1952_v45, %v1954_v61 }
 0x583   : > { %v1957_v49 = vmul.f32 1.442695, %v1955_v15  ;;  %v1963_v16 = vmul.f32 1.442695, %v1961_v40 }
 0x584   : > { %v1959_v38 = vmul.f32 1.442695, %v1956_v42  ;;  %v1965_v39 = vmul.f32 1.442695, %v1962_v43 }
 0x585   : > { %2327 = vpow2.f32 %v1957_v49 }
 0x586   : > { %2329 = vpow2.f32 %v1963_v16 }
 0x587   : > { %2331 = vpow2.f32 %v1959_v38 }
 0x588   : > { %2333 = vpow2.f32 %v1965_v39 }
 0x58f   : > { %v2328_v41 = vpop.eup %2327 }
 0x590   : > { %v2330_v44 = vpop.eup %2329 }
 0x591   : > { %v2332_v46 = vpop.eup %2331  ;;  %v1967_v12 = vadd.f32 %v2330_v44, %v2328_v41 }
 0x592   : > { %v2334_v47 = vpop.eup %2333 }
 0x593   : > { %v1968_v48 = vadd.f32 %v2334_v47, %v2332_v46  ;;  %2335 = vlog2.f32 %v1967_v12 }
 0x595   : > { %2337 = vlog2.f32 %v1968_v48 }
 0x59d   : > { %v2336_v50 = vpop.eup %2335 }
 0x59e   : > { %v1970_v18 = vmul.f32 0.6931472, %v2336_v50 }
 0x59f   : > { %v2338_v51 = vpop.eup %2337 }
 0x5a0   : > { %v1972_v52 = vmul.f32 0.6931472, %v2338_v51  ;;  %v1973_v53 = vadd.f32 %v1970_v18, %v1953_v54 }
 0x5a2   : > { %v1974_v19 = vadd.f32 %v1972_v52, %v1954_v61 }
 0x5a4   : > { %v1977_v7 = vcombine.low %v1973_v53, %v1974_v19 }
 0x5a6   : > { %1979 = vst [vmem:[%s383_s30] sm:$0x77] %v1977_v7 }
 0x5a7   : > { %2352 = shalt.err (!%p2349_p5)
}
 0x5a8   : > { %s2353_s12 = scalar_lea.hbm %s2890_s21, 128  ;;  %s2357_s18 = scalar_lea.hbm %s2944_s10, 256 }
 0x5a9   : > { %p2354_p7 = scmp.ne.s32.totalorder %s2890_s21, %s2353_s12  ;;  %p2358_p12 = scmp.lt.u32.totalorder %s2890_s21, %s2944_s10 }
 0x5aa   : > { %p2359_p13 = scmp.lt.u32.totalorder %s2357_s18, %s2353_s12  ;;  %p2361_p1 = scmp.lt.u32.totalorder %s2353_s12, %s2890_s21 }
 0x5ab   : > { %p2355_p10 = pnand %p2354_p7, %p2499_p6 }
 0x5ac   : > { %p2360_p0 = por %p2359_p13, %p2358_p12 }
 0x5ad   : > { %p2356_p11 = pneg %p2355_p10 }
 0x5ae   : > { %p2362_p2 = por %p2361_p1, %p2360_p0 }
 0x5b0   : > { %p2363_p3 = pnand %p2362_p2, %p2356_p11 }
 0x5b2   : > { %2366 = shalt.err (!%p2363_p3)
}
 0x5b3   : > { %2248 = dma.vmem_to_hbm [thread:$0]  (%p2499_p6), %s2892_s11, 128, %s2890_s21, %s1981_s25  }
 0x5b4 PF: > { %s2007_s26 = sand.u32 1, %s2389_s13   ;;  %p2251_p4 = pnand %p2062_p9, %p2503_p8 }
 0x5b5   : > { %s2008_s27 = scalar_lea.sflag [#allocation4], %s2007_s26 }
 0x5b6   : > { %2384 = dma.done.wait (!%p2251_p4), %s2008_s27, 128  }
 0x5b7   : > { %2386 = vsyncadd (!%p2251_p4), %s2008_s27, 4294967168  ;;  %p20_p5 = scmp.ge.s32.totalorder %s2484_s19, 4   ;;  %s2947_s13 = smov %s2393_s14 }
 0x5b8   : > { %s2948_s14 = smov %s2397_s15  ;;  %s2949_s15 = smov %s2497_s22 }
 0x5b9   : > { %s2950_s16 = smov %s2484_s19  ;;  %22 = sbr.rel (!%p20_p5) target bundleno = 3 (0x3), region = 124 }
 0x5c0   :  { %2013 = vsyncpa [#allocation4], 1 }
 0x5c1   :  { %2015 = vsyncpa [#allocation4 + $0x1], 1 }

</bundles_post_ra>
